<compile_context>
chip_gen: v5e
topology: v5e:2x2
jax: 0.10.0
libtpu: 0.0.40
codegen_flags: <defaults>
</compile_context>

<pallas_src>
import jax
import jax.numpy as jnp
from jax import lax
from jax.experimental import pallas as pl
from jax.experimental.pallas import tpu as pltpu

LANE = 128      # minimum batch-lane tile (keeps outputs lane-dense)
F_TOP = 8       # state rows: [thr, DOD, V_av, C, R, bias=1, 0, 0]
H_TOP = 16      # padded hidden rows (real hidden = 10)
SUB = 8         # Euler steps per store block (one full (8,L) vst per output)
T_TARGET = 256  # Euler steps per grid step (time chunk)


def _aging_kernel(s0_ref, thr_ref, w1_ref, w2_ref, b2_ref,
                  outc_ref, outr_ref, state_ref):
    # s0_ref   : (F_TOP, L)     initial transposed state for this batch tile
    # thr_ref  : (T, L)         row j = throughput[:, global_step_j] (streamed)
    # w1_ref   : (H_TOP, F_TOP) W1 with b1 folded into column 5 (bias row)
    # w2_ref   : (F_TOP, H_TOP) W2
    # b2_ref   : (F_TOP, L)     b2 pre-broadcast over lanes
    # outc/outr: (T, L)         lane-dense C / R history for this chunk
    # state_ref: (F_TOP, L)     carried state across time chunks

    @pl.when(pl.program_id(1) == 0)
    def _():
        state_ref[...] = s0_ref[...]

    w1 = w1_ref[...]                       # (16, 8)  -- natural K=8 contraction
    w2 = w2_ref[...]                       # (8, 16)  -- natural K=16 contraction
    b2 = b2_ref[...]                       # (8, L)
    steps = thr_ref.shape[0]
    lanes = thr_ref.shape[1]

    row = lax.broadcasted_iota(jnp.int32, (F_TOP, lanes), 0)
    is_thr = row == 0                                        # overwritten with throughput[:, i]
    cr_mask = ((row == 3) | (row == 4)).astype(jnp.float32)  # C / R rows evolve via Euler

    def block_body(blk, s):
        base = pl.multiple_of(blk * SUB, SUB)
        thr_blk = thr_ref[pl.ds(base, SUB), :]               # (8, L), one aligned load
        thr_prev = s[0:1, :]                                 # == throughput[:, i-1]
        c_rows, r_rows = [], []
        for j in range(SUB):                                 # static 8-step sub-block
            thr_j = thr_blk[j:j + 1, :]                      # (1, L)
            h_j = thr_j - thr_prev                           # exact Euler step size
            hid = jnp.tanh(jnp.dot(w1, s, preferred_element_type=jnp.float32))
            f = jnp.dot(w2, hid, preferred_element_type=jnp.float32) + b2
            s = jnp.where(is_thr, thr_j, s + cr_mask * (h_j * f))
            c_rows.append(s[3:4, :])
            r_rows.append(s[4:5, :])
            thr_prev = thr_j
        # one full unmasked (8, L) store per output per 8 steps
        outc_ref[pl.ds(base, SUB), :] = jnp.concatenate(c_rows, axis=0)
        outr_ref[pl.ds(base, SUB), :] = jnp.concatenate(r_rows, axis=0)
        return s

    s_final = lax.fori_loop(0, steps // SUB, block_body, state_ref[...])
    state_ref[...] = s_final


def _choose_lane_block(b_pad):
    """Lane tile width: >=128 (lane-dense stores), as wide as possible up to
    512, with >=2 batch tiles when B_pad allows it (both v7x TensorCores)."""
    if b_pad <= LANE:
        return LANE
    tiles128 = b_pad // LANE
    n_tiles = max(2, -(-b_pad // 512))
    while tiles128 % n_tiles:
        n_tiles += 1
    return b_pad // n_tiles


def neural_network_forward(throughput, DOD, V_av, C_0, R_0, n, params):
    """throughput: (B, n+1); DOD, V_av, C_0, R_0: (1, B)  (PyTorch layout)."""
    W1, b1, W2, b2 = params  # (10,5), (10,), (5,10), (5,)
    thr = jnp.asarray(throughput, jnp.float32)
    dod = jnp.asarray(DOD, jnp.float32)
    vav = jnp.asarray(V_av, jnp.float32)
    c0 = jnp.asarray(C_0, jnp.float32)
    r0 = jnp.asarray(R_0, jnp.float32)
    B = thr.shape[0]

    first = jnp.stack([c0[0], r0[0]], axis=-1)[:, None, :]     # (B, 1, 2) = y_0
    if n == 0:
        return first

    B_pad = -(-B // LANE) * LANE
    lane_blk = _choose_lane_block(B_pad)
    n_bt = B_pad // lane_blk
    n_pad8 = -(-n // SUB) * SUB
    T = min(T_TARGET, n_pad8)              # time chunk (multiple of 8)
    n_chunks = -(-n // T)
    n_pad = n_chunks * T

    # ---- transposed initial state: rows = features, lanes = batch ----
    s0 = jnp.zeros((F_TOP, B_pad), jnp.float32)
    s0 = s0.at[0, :B].set(thr[:, 0])
    s0 = s0.at[1, :B].set(dod[0])
    s0 = s0.at[2, :B].set(vav[0])
    s0 = s0.at[3, :B].set(c0[0])
    s0 = s0.at[4, :B].set(r0[0])
    s0 = s0.at[5, :].set(1.0)              # bias row feeding the folded b1

    # per-step throughput rows; padded time steps repeat the last column so the
    # derived Euler step size is exactly zero there (state frozen, rows sliced off).
    thr_rows = thr[:, 1:n + 1].T                               # (n, B)
    if n_pad > n:
        thr_rows = jnp.concatenate(
            [thr_rows, jnp.tile(thr_rows[-1:], (n_pad - n, 1))], axis=0)
    thr_rows = jnp.pad(thr_rows, ((0, 0), (0, B_pad - B)))

    # ---- MLP params at natural contraction sizes (K=8 / K=16) ----
    w1_p = jnp.zeros((H_TOP, F_TOP), jnp.float32)
    w1_p = w1_p.at[:10, :5].set(jnp.asarray(W1, jnp.float32))
    w1_p = w1_p.at[:10, 5].set(jnp.asarray(b1, jnp.float32))   # b1 folded via bias row
    w2_p = jnp.zeros((F_TOP, H_TOP), jnp.float32)
    w2_p = w2_p.at[:5, :10].set(jnp.asarray(W2, jnp.float32))
    b2_p = jnp.zeros((F_TOP, lane_blk), jnp.float32)
    b2_p = b2_p.at[:5, :].set(jnp.asarray(b2, jnp.float32)[:, None])

    out_c, out_r = pl.pallas_call(
        _aging_kernel,
        out_shape=(jax.ShapeDtypeStruct((n_pad, B_pad), jnp.float32),
                   jax.ShapeDtypeStruct((n_pad, B_pad), jnp.float32)),
        grid_spec=pltpu.PrefetchScalarGridSpec(
            num_scalar_prefetch=0,
            grid=(n_bt, n_chunks),         # batch tiles (parallel) x time chunks (arbitrary)
            in_specs=[
                pl.BlockSpec((F_TOP, lane_blk), lambda b, g: (0, b)),    # s0
                pl.BlockSpec((T, lane_blk), lambda b, g: (g, b)),        # thr rows (streamed)
                pl.BlockSpec((H_TOP, F_TOP), lambda b, g: (0, 0)),       # W1 (+b1)
                pl.BlockSpec((F_TOP, H_TOP), lambda b, g: (0, 0)),       # W2
                pl.BlockSpec((F_TOP, lane_blk), lambda b, g: (0, 0)),    # b2
            ],
            out_specs=[
                pl.BlockSpec((T, lane_blk), lambda b, g: (g, b)),        # C history
                pl.BlockSpec((T, lane_blk), lambda b, g: (g, b)),        # R history
            ],
            scratch_shapes=[pltpu.VMEM((F_TOP, lane_blk), jnp.float32)],
        ),
        compiler_params=pltpu.CompilerParams(
            dimension_semantics=("parallel", "arbitrary")),
    )(s0, thr_rows, w1_p, w2_p, b2_p)

    c_hist = out_c[:n, :B].T               # (B, n)
    r_hist = out_r[:n, :B].T
    rest = jnp.stack([c_hist, r_hist], axis=-1)                # (B, n, 2)
    return jnp.concatenate([first, rest], axis=1)              # (B, n+1, 2)


def ref_forward(throughput, DOD, V_av, C_0, R_0, n, params):
    """Pure-JAX reference mirroring the PyTorch forward exactly."""
    W1, b1, W2, b2 = params

    def mlp(x):
        return jnp.tanh(x @ W1.T + b1) @ W2.T + b2

    y0 = jnp.concatenate(
        [throughput[:, 0:1], DOD.T, V_av.T, C_0.T, R_0.T], axis=1
    )
    ys = [y0]
    s = y0
    for i in range(1, n + 1):
        hstep = (throughput[:, i] - throughput[:, i - 1])[:, None]
        t = s + hstep * mlp(s)
        s = jnp.concatenate(
            [throughput[:, i:i + 1], y0[:, 1:3], t[:, 3:5]], axis=1
        )
        ys.append(s)
    y = jnp.stack(ys, axis=1)  # (B, n+1, 5)
    return y[:, :, -2:]


def _make_case(key, B, n):
    k = jax.random.split(key, 9)
    thr = jnp.cumsum(jax.random.uniform(k[0], (B, n + 1), jnp.float32, 0.1, 1.0), axis=1)
    DOD = jax.random.uniform(k[1], (1, B), jnp.float32, 0.2, 0.9)
    V_av = jax.random.uniform(k[2], (1, B), jnp.float32, 3.2, 4.1)
    C_0 = jax.random.uniform(k[3], (1, B), jnp.float32, 0.9, 1.0)
    R_0 = jax.random.uniform(k[4], (1, B), jnp.float32, 0.01, 0.05)
    W1 = 0.1 * jax.random.normal(k[5], (10, 5), jnp.float32)
    b1 = 0.1 * jax.random.normal(k[6], (10,), jnp.float32)
    W2 = 0.1 * jax.random.normal(k[7], (5, 10), jnp.float32)
    b2 = 0.1 * jax.random.normal(k[8], (5,), jnp.float32)
    return thr, DOD, V_av, C_0, R_0, (W1, b1, W2, b2)


if __name__ == "__main__":
    key = jax.random.PRNGKey(0)
    k1, k2 = jax.random.split(key)

    # case 1: small batch, n multiple of 8
    B, n = 2, 8
    thr, DOD, V_av, C_0, R_0, params = _make_case(k1, B, n)
    out = jax.block_until_ready(neural_network_forward(thr, DOD, V_av, C_0, R_0, n, params))
    ref = ref_forward(thr, DOD, V_av, C_0, R_0, n, params)
    assert out.shape == (B, n + 1, 2), out.shape
    assert jnp.allclose(out, ref, atol=1e-5, rtol=1e-5), float(jnp.max(jnp.abs(out - ref)))

    # case 2: n not a multiple of 8 (exercises time padding + multi-block fori_loop)
    B, n = 3, 13
    thr, DOD, V_av, C_0, R_0, params = _make_case(k2, B, n)
    out = jax.block_until_ready(neural_network_forward(thr, DOD, V_av, C_0, R_0, n, params))
    ref = ref_forward(thr, DOD, V_av, C_0, R_0, n, params)
    assert out.shape == (B, n + 1, 2), out.shape
    assert jnp.allclose(out, ref, atol=1e-5, rtol=1e-5), float(jnp.max(jnp.abs(out - ref)))

    print("KERNEL_OK")
</pallas_src>

<mosaic_0001>
module attributes {stable_mosaic.version = 11 : i64} {
  func.func @_aging_kernel(%arg0: i32, %arg1: i32, %arg2: memref<8x128xf32, #tpu.memory_space<vmem>>, %arg3: memref<8x128xf32, #tpu.memory_space<vmem>>, %arg4: memref<16x8xf32, #tpu.memory_space<vmem>>, %arg5: memref<8x16xf32, #tpu.memory_space<vmem>>, %arg6: memref<8x128xf32, #tpu.memory_space<vmem>>, %arg7: memref<8x128xf32, #tpu.memory_space<vmem>>, %arg8: memref<8x128xf32, #tpu.memory_space<vmem>>, %arg9: memref<8x128xf32, #tpu.memory_space<vmem>>) attributes {dimension_semantics = [#tpu.dimension_semantics<parallel>, #tpu.dimension_semantics<arbitrary>], iteration_bounds = array<i64: 1, 1>, scalar_prefetch = 0 : i64, scratch_operands = 1 : i64, tpu.core_type = #tpu.core_type<tc>, window_params = [{transform_indices = @transform_0, window_bounds = array<i64: 8, 128>}, {transform_indices = @transform_1, window_bounds = array<i64: 8, 128>}, {pipeline_mode = #tpu.pipeline_mode<synchronous>, transform_indices = @transform_2, window_bounds = array<i64: 16, 8>}, {pipeline_mode = #tpu.pipeline_mode<synchronous>, transform_indices = @transform_3, window_bounds = array<i64: 8, 16>}, {pipeline_mode = #tpu.pipeline_mode<synchronous>, transform_indices = @transform_4, window_bounds = array<i64: 8, 128>}, {transform_indices = @transform_5, window_bounds = array<i64: 8, 128>}, {transform_indices = @transform_6, window_bounds = array<i64: 8, 128>}]} {
    %c0_i32 = arith.constant 0 : i32
    %0 = arith.cmpi eq, %arg1, %c0_i32 : i32
    %1 = arith.extui %0 : i1 to i32
    %c0_i32_0 = arith.constant 0 : i32
    %2 = arith.cmpi ne, %1, %c0_i32_0 : i32
    scf.if %2 {
      %c0_30 = arith.constant 0 : index
      %c0_31 = arith.constant 0 : index
      %149 = vector.load %arg2[%c0_30, %c0_31] : memref<8x128xf32, #tpu.memory_space<vmem>>, vector<8x128xf32>
      %c0_32 = arith.constant 0 : index
      %c0_33 = arith.constant 0 : index
      %150 = vector.load %arg9[%c0_32, %c0_33] : memref<8x128xf32, #tpu.memory_space<vmem>>, vector<8x128xf32>
      tpu.vector_store %arg9[%c0_32, %c0_33], %149 {strides = array<i32>} : memref<8x128xf32, #tpu.memory_space<vmem>>, vector<8x128xf32>,
    } else {
    }
    %c0 = arith.constant 0 : index
    %c0_1 = arith.constant 0 : index
    %3 = vector.load %arg4[%c0, %c0_1] : memref<16x8xf32, #tpu.memory_space<vmem>>, vector<16x8xf32>
    %c0_2 = arith.constant 0 : index
    %c0_3 = arith.constant 0 : index
    %4 = vector.load %arg5[%c0_2, %c0_3] : memref<8x16xf32, #tpu.memory_space<vmem>>, vector<8x16xf32>
    %c0_4 = arith.constant 0 : index
    %c0_5 = arith.constant 0 : index
    %5 = vector.load %arg6[%c0_4, %c0_5] : memref<8x128xf32, #tpu.memory_space<vmem>>, vector<8x128xf32>
    %6 = tpu.iota {dimensions = array<i32: 0>} : vector<8x128xi32>
    %c0_i32_6 = arith.constant 0 : i32
    %7 = vector.broadcast %c0_i32_6 : i32 to vector<8x128xi32>
    %8 = arith.cmpi eq, %6, %7 : vector<8x128xi32>
    %c3_i32 = arith.constant 3 : i32
    %9 = vector.broadcast %c3_i32 : i32 to vector<8x128xi32>
    %10 = arith.cmpi eq, %6, %9 : vector<8x128xi32>
    %c4_i32 = arith.constant 4 : i32
    %11 = vector.broadcast %c4_i32 : i32 to vector<8x128xi32>
    %12 = arith.cmpi eq, %6, %11 : vector<8x128xi32>
    %13 = arith.ori %10, %12 : vector<8x128xi1>
    %14 = arith.extui %13 : vector<8x128xi1> to vector<8x128xi32>
    %15 = arith.sitofp %14 : vector<8x128xi32> to vector<8x128xf32>
    %c0_7 = arith.constant 0 : index
    %c0_8 = arith.constant 0 : index
    %16 = vector.load %arg9[%c0_7, %c0_8] : memref<8x128xf32, #tpu.memory_space<vmem>>, vector<8x128xf32>
    %c0_i32_9 = arith.constant 0 : i32
    %c8_i32 = arith.constant 8 : i32
    %17 = arith.muli %c0_i32_9, %c8_i32 : i32
    %18 = tpu.assume_multiple %17, 8 : i32
    %19 = arith.index_cast %18 : i32 to index
    %c0_10 = arith.constant 0 : index
    %20 = vector.load %arg3[%19, %c0_10] : memref<8x128xf32, #tpu.memory_space<vmem>>, vector<8x128xf32>
    %21 = vector.extract_strided_slice %16 {offsets = [0, 0], sizes = [1, 128], strides = [1, 1]} : vector<8x128xf32> to vector<1x128xf32>
    %22 = vector.extract_strided_slice %20 {offsets = [0, 0], sizes = [1, 128], strides = [1, 1]} : vector<8x128xf32> to vector<1x128xf32>
    %23 = arith.subf %22, %21 : vector<1x128xf32>
    %cst = arith.constant dense<0.000000e+00> : vector<16x128xf32>
    %24 = tpu.matmul %3, %16, %cst {dimension_numbers = #tpu.dot_dimension_numbers<[1], [0], [0], [1], [0, 0, 1, 1], [], []>} : vector<16x8xf32>, vector<8x128xf32>, vector<16x128xf32> -> vector<16x128xf32>
    %25 = math.tanh %24 : vector<16x128xf32>
    %cst_11 = arith.constant dense<0.000000e+00> : vector<8x128xf32>
    %26 = tpu.matmul %4, %25, %cst_11 {dimension_numbers = #tpu.dot_dimension_numbers<[1], [0], [0], [1], [0, 0, 1, 1], [], []>} : vector<8x16xf32>, vector<16x128xf32>, vector<8x128xf32> -> vector<8x128xf32>
    %27 = arith.addf %26, %5 : vector<8x128xf32>
    %28 = vector.broadcast %23 : vector<1x128xf32> to vector<8x128xf32>
    %29 = arith.mulf %28, %27 : vector<8x128xf32>
    %30 = arith.mulf %15, %29 : vector<8x128xf32>
    %31 = arith.addf %16, %30 : vector<8x128xf32>
    %32 = vector.shape_cast %22 : vector<1x128xf32> to vector<1x128xf32>
    %33 = vector.broadcast %32 : vector<1x128xf32> to vector<8x128xf32>
    %34 = arith.select %8, %33, %31 : vector<8x128xi1>, vector<8x128xf32>
    %35 = vector.extract_strided_slice %34 {offsets = [3, 0], sizes = [1, 128], strides = [1, 1]} : vector<8x128xf32> to vector<1x128xf32>
    %36 = vector.extract_strided_slice %34 {offsets = [4, 0], sizes = [1, 128], strides = [1, 1]} : vector<8x128xf32> to vector<1x128xf32>
    %37 = vector.extract_strided_slice %20 {offsets = [1, 0], sizes = [1, 128], strides = [1, 1]} : vector<8x128xf32> to vector<1x128xf32>
    %38 = arith.subf %37, %22 : vector<1x128xf32>
    %cst_12 = arith.constant dense<0.000000e+00> : vector<16x128xf32>
    %39 = tpu.matmul %3, %34, %cst_12 {dimension_numbers = #tpu.dot_dimension_numbers<[1], [0], [0], [1], [0, 0, 1, 1], [], []>} : vector<16x8xf32>, vector<8x128xf32>, vector<16x128xf32> -> vector<16x128xf32>
    %40 = math.tanh %39 : vector<16x128xf32>
    %cst_13 = arith.constant dense<0.000000e+00> : vector<8x128xf32>
    %41 = tpu.matmul %4, %40, %cst_13 {dimension_numbers = #tpu.dot_dimension_numbers<[1], [0], [0], [1], [0, 0, 1, 1], [], []>} : vector<8x16xf32>, vector<16x128xf32>, vector<8x128xf32> -> vector<8x128xf32>
    %42 = arith.addf %41, %5 : vector<8x128xf32>
    %43 = vector.broadcast %38 : vector<1x128xf32> to vector<8x128xf32>
    %44 = arith.mulf %43, %42 : vector<8x128xf32>
    %45 = arith.mulf %15, %44 : vector<8x128xf32>
    %46 = arith.addf %34, %45 : vector<8x128xf32>
    %47 = vector.shape_cast %37 : vector<1x128xf32> to vector<1x128xf32>
    %48 = vector.broadcast %47 : vector<1x128xf32> to vector<8x128xf32>
    %49 = arith.select %8, %48, %46 : vector<8x128xi1>, vector<8x128xf32>
    %50 = vector.extract_strided_slice %49 {offsets = [3, 0], sizes = [1, 128], strides = [1, 1]} : vector<8x128xf32> to vector<1x128xf32>
    %51 = vector.extract_strided_slice %49 {offsets = [4, 0], sizes = [1, 128], strides = [1, 1]} : vector<8x128xf32> to vector<1x128xf32>
    %52 = vector.extract_strided_slice %20 {offsets = [2, 0], sizes = [1, 128], strides = [1, 1]} : vector<8x128xf32> to vector<1x128xf32>
    %53 = arith.subf %52, %37 : vector<1x128xf32>
    %cst_14 = arith.constant dense<0.000000e+00> : vector<16x128xf32>
    %54 = tpu.matmul %3, %49, %cst_14 {dimension_numbers = #tpu.dot_dimension_numbers<[1], [0], [0], [1], [0, 0, 1, 1], [], []>} : vector<16x8xf32>, vector<8x128xf32>, vector<16x128xf32> -> vector<16x128xf32>
    %55 = math.tanh %54 : vector<16x128xf32>
    %cst_15 = arith.constant dense<0.000000e+00> : vector<8x128xf32>
    %56 = tpu.matmul %4, %55, %cst_15 {dimension_numbers = #tpu.dot_dimension_numbers<[1], [0], [0], [1], [0, 0, 1, 1], [], []>} : vector<8x16xf32>, vector<16x128xf32>, vector<8x128xf32> -> vector<8x128xf32>
    %57 = arith.addf %56, %5 : vector<8x128xf32>
    %58 = vector.broadcast %53 : vector<1x128xf32> to vector<8x128xf32>
    %59 = arith.mulf %58, %57 : vector<8x128xf32>
    %60 = arith.mulf %15, %59 : vector<8x128xf32>
    %61 = arith.addf %49, %60 : vector<8x128xf32>
    %62 = vector.shape_cast %52 : vector<1x128xf32> to vector<1x128xf32>
    %63 = vector.broadcast %62 : vector<1x128xf32> to vector<8x128xf32>
    %64 = arith.select %8, %63, %61 : vector<8x128xi1>, vector<8x128xf32>
    %65 = vector.extract_strided_slice %64 {offsets = [3, 0], sizes = [1, 128], strides = [1, 1]} : vector<8x128xf32> to vector<1x128xf32>
    %66 = vector.extract_strided_slice %64 {offsets = [4, 0], sizes = [1, 128], strides = [1, 1]} : vector<8x128xf32> to vector<1x128xf32>
    %67 = vector.extract_strided_slice %20 {offsets = [3, 0], sizes = [1, 128], strides = [1, 1]} : vector<8x128xf32> to vector<1x128xf32>
    %68 = arith.subf %67, %52 : vector<1x128xf32>
    %cst_16 = arith.constant dense<0.000000e+00> : vector<16x128xf32>
    %69 = tpu.matmul %3, %64, %cst_16 {dimension_numbers = #tpu.dot_dimension_numbers<[1], [0], [0], [1], [0, 0, 1, 1], [], []>} : vector<16x8xf32>, vector<8x128xf32>, vector<16x128xf32> -> vector<16x128xf32>
    %70 = math.tanh %69 : vector<16x128xf32>
    %cst_17 = arith.constant dense<0.000000e+00> : vector<8x128xf32>
    %71 = tpu.matmul %4, %70, %cst_17 {dimension_numbers = #tpu.dot_dimension_numbers<[1], [0], [0], [1], [0, 0, 1, 1], [], []>} : vector<8x16xf32>, vector<16x128xf32>, vector<8x128xf32> -> vector<8x128xf32>
    %72 = arith.addf %71, %5 : vector<8x128xf32>
    %73 = vector.broadcast %68 : vector<1x128xf32> to vector<8x128xf32>
    %74 = arith.mulf %73, %72 : vector<8x128xf32>
    %75 = arith.mulf %15, %74 : vector<8x128xf32>
    %76 = arith.addf %64, %75 : vector<8x128xf32>
    %77 = vector.shape_cast %67 : vector<1x128xf32> to vector<1x128xf32>
    %78 = vector.broadcast %77 : vector<1x128xf32> to vector<8x128xf32>
    %79 = arith.select %8, %78, %76 : vector<8x128xi1>, vector<8x128xf32>
    %80 = vector.extract_strided_slice %79 {offsets = [3, 0], sizes = [1, 128], strides = [1, 1]} : vector<8x128xf32> to vector<1x128xf32>
    %81 = vector.extract_strided_slice %79 {offsets = [4, 0], sizes = [1, 128], strides = [1, 1]} : vector<8x128xf32> to vector<1x128xf32>
    %82 = vector.extract_strided_slice %20 {offsets = [4, 0], sizes = [1, 128], strides = [1, 1]} : vector<8x128xf32> to vector<1x128xf32>
    %83 = arith.subf %82, %67 : vector<1x128xf32>
    %cst_18 = arith.constant dense<0.000000e+00> : vector<16x128xf32>
    %84 = tpu.matmul %3, %79, %cst_18 {dimension_numbers = #tpu.dot_dimension_numbers<[1], [0], [0], [1], [0, 0, 1, 1], [], []>} : vector<16x8xf32>, vector<8x128xf32>, vector<16x128xf32> -> vector<16x128xf32>
    %85 = math.tanh %84 : vector<16x128xf32>
    %cst_19 = arith.constant dense<0.000000e+00> : vector<8x128xf32>
    %86 = tpu.matmul %4, %85, %cst_19 {dimension_numbers = #tpu.dot_dimension_numbers<[1], [0], [0], [1], [0, 0, 1, 1], [], []>} : vector<8x16xf32>, vector<16x128xf32>, vector<8x128xf32> -> vector<8x128xf32>
    %87 = arith.addf %86, %5 : vector<8x128xf32>
    %88 = vector.broadcast %83 : vector<1x128xf32> to vector<8x128xf32>
    %89 = arith.mulf %88, %87 : vector<8x128xf32>
    %90 = arith.mulf %15, %89 : vector<8x128xf32>
    %91 = arith.addf %79, %90 : vector<8x128xf32>
    %92 = vector.shape_cast %82 : vector<1x128xf32> to vector<1x128xf32>
    %93 = vector.broadcast %92 : vector<1x128xf32> to vector<8x128xf32>
    %94 = arith.select %8, %93, %91 : vector<8x128xi1>, vector<8x128xf32>
    %95 = vector.extract_strided_slice %94 {offsets = [3, 0], sizes = [1, 128], strides = [1, 1]} : vector<8x128xf32> to vector<1x128xf32>
    %96 = vector.extract_strided_slice %94 {offsets = [4, 0], sizes = [1, 128], strides = [1, 1]} : vector<8x128xf32> to vector<1x128xf32>
    %97 = vector.extract_strided_slice %20 {offsets = [5, 0], sizes = [1, 128], strides = [1, 1]} : vector<8x128xf32> to vector<1x128xf32>
    %98 = arith.subf %97, %82 : vector<1x128xf32>
    %cst_20 = arith.constant dense<0.000000e+00> : vector<16x128xf32>
    %99 = tpu.matmul %3, %94, %cst_20 {dimension_numbers = #tpu.dot_dimension_numbers<[1], [0], [0], [1], [0, 0, 1, 1], [], []>} : vector<16x8xf32>, vector<8x128xf32>, vector<16x128xf32> -> vector<16x128xf32>
    %100 = math.tanh %99 : vector<16x128xf32>
    %cst_21 = arith.constant dense<0.000000e+00> : vector<8x128xf32>
    %101 = tpu.matmul %4, %100, %cst_21 {dimension_numbers = #tpu.dot_dimension_numbers<[1], [0], [0], [1], [0, 0, 1, 1], [], []>} : vector<8x16xf32>, vector<16x128xf32>, vector<8x128xf32> -> vector<8x128xf32>
    %102 = arith.addf %101, %5 : vector<8x128xf32>
    %103 = vector.broadcast %98 : vector<1x128xf32> to vector<8x128xf32>
    %104 = arith.mulf %103, %102 : vector<8x128xf32>
    %105 = arith.mulf %15, %104 : vector<8x128xf32>
    %106 = arith.addf %94, %105 : vector<8x128xf32>
    %107 = vector.shape_cast %97 : vector<1x128xf32> to vector<1x128xf32>
    %108 = vector.broadcast %107 : vector<1x128xf32> to vector<8x128xf32>
    %109 = arith.select %8, %108, %106 : vector<8x128xi1>, vector<8x128xf32>
    %110 = vector.extract_strided_slice %109 {offsets = [3, 0], sizes = [1, 128], strides = [1, 1]} : vector<8x128xf32> to vector<1x128xf32>
    %111 = vector.extract_strided_slice %109 {offsets = [4, 0], sizes = [1, 128], strides = [1, 1]} : vector<8x128xf32> to vector<1x128xf32>
    %112 = vector.extract_strided_slice %20 {offsets = [6, 0], sizes = [1, 128], strides = [1, 1]} : vector<8x128xf32> to vector<1x128xf32>
    %113 = arith.subf %112, %97 : vector<1x128xf32>
    %cst_22 = arith.constant dense<0.000000e+00> : vector<16x128xf32>
    %114 = tpu.matmul %3, %109, %cst_22 {dimension_numbers = #tpu.dot_dimension_numbers<[1], [0], [0], [1], [0, 0, 1, 1], [], []>} : vector<16x8xf32>, vector<8x128xf32>, vector<16x128xf32> -> vector<16x128xf32>
    %115 = math.tanh %114 : vector<16x128xf32>
    %cst_23 = arith.constant dense<0.000000e+00> : vector<8x128xf32>
    %116 = tpu.matmul %4, %115, %cst_23 {dimension_numbers = #tpu.dot_dimension_numbers<[1], [0], [0], [1], [0, 0, 1, 1], [], []>} : vector<8x16xf32>, vector<16x128xf32>, vector<8x128xf32> -> vector<8x128xf32>
    %117 = arith.addf %116, %5 : vector<8x128xf32>
    %118 = vector.broadcast %113 : vector<1x128xf32> to vector<8x128xf32>
    %119 = arith.mulf %118, %117 : vector<8x128xf32>
    %120 = arith.mulf %15, %119 : vector<8x128xf32>
    %121 = arith.addf %109, %120 : vector<8x128xf32>
    %122 = vector.shape_cast %112 : vector<1x128xf32> to vector<1x128xf32>
    %123 = vector.broadcast %122 : vector<1x128xf32> to vector<8x128xf32>
    %124 = arith.select %8, %123, %121 : vector<8x128xi1>, vector<8x128xf32>
    %125 = vector.extract_strided_slice %124 {offsets = [3, 0], sizes = [1, 128], strides = [1, 1]} : vector<8x128xf32> to vector<1x128xf32>
    %126 = vector.extract_strided_slice %124 {offsets = [4, 0], sizes = [1, 128], strides = [1, 1]} : vector<8x128xf32> to vector<1x128xf32>
    %127 = vector.extract_strided_slice %20 {offsets = [7, 0], sizes = [1, 128], strides = [1, 1]} : vector<8x128xf32> to vector<1x128xf32>
    %128 = arith.subf %127, %112 : vector<1x128xf32>
    %cst_24 = arith.constant dense<0.000000e+00> : vector<16x128xf32>
    %129 = tpu.matmul %3, %124, %cst_24 {dimension_numbers = #tpu.dot_dimension_numbers<[1], [0], [0], [1], [0, 0, 1, 1], [], []>} : vector<16x8xf32>, vector<8x128xf32>, vector<16x128xf32> -> vector<16x128xf32>
    %130 = math.tanh %129 : vector<16x128xf32>
    %cst_25 = arith.constant dense<0.000000e+00> : vector<8x128xf32>
    %131 = tpu.matmul %4, %130, %cst_25 {dimension_numbers = #tpu.dot_dimension_numbers<[1], [0], [0], [1], [0, 0, 1, 1], [], []>} : vector<8x16xf32>, vector<16x128xf32>, vector<8x128xf32> -> vector<8x128xf32>
    %132 = arith.addf %131, %5 : vector<8x128xf32>
    %133 = vector.broadcast %128 : vector<1x128xf32> to vector<8x128xf32>
    %134 = arith.mulf %133, %132 : vector<8x128xf32>
    %135 = arith.mulf %15, %134 : vector<8x128xf32>
    %136 = arith.addf %124, %135 : vector<8x128xf32>
    %137 = vector.shape_cast %127 : vector<1x128xf32> to vector<1x128xf32>
    %138 = vector.broadcast %137 : vector<1x128xf32> to vector<8x128xf32>
    %139 = arith.select %8, %138, %136 : vector<8x128xi1>, vector<8x128xf32>
    %140 = vector.extract_strided_slice %139 {offsets = [3, 0], sizes = [1, 128], strides = [1, 1]} : vector<8x128xf32> to vector<1x128xf32>
    %141 = vector.extract_strided_slice %139 {offsets = [4, 0], sizes = [1, 128], strides = [1, 1]} : vector<8x128xf32> to vector<1x128xf32>
    %142 = tpu.concatenate %35, %50, %65, %80, %95, %110, %125, %140 in 0 : vector<1x128xf32>, vector<1x128xf32>, vector<1x128xf32>, vector<1x128xf32>, vector<1x128xf32>, vector<1x128xf32>, vector<1x128xf32>, vector<1x128xf32> -> vector<8x128xf32>
    %143 = arith.index_cast %18 : i32 to index
    %c0_26 = arith.constant 0 : index
    %144 = vector.load %arg7[%143, %c0_26] : memref<8x128xf32, #tpu.memory_space<vmem>>, vector<8x128xf32>
    tpu.vector_store %arg7[%143, %c0_26], %142 {strides = array<i32>} : memref<8x128xf32, #tpu.memory_space<vmem>>, vector<8x128xf32>,
    %145 = tpu.concatenate %36, %51, %66, %81, %96, %111, %126, %141 in 0 : vector<1x128xf32>, vector<1x128xf32>, vector<1x128xf32>, vector<1x128xf32>, vector<1x128xf32>, vector<1x128xf32>, vector<1x128xf32>, vector<1x128xf32> -> vector<8x128xf32>
    %146 = arith.index_cast %18 : i32 to index
    %c0_27 = arith.constant 0 : index
    %147 = vector.load %arg8[%146, %c0_27] : memref<8x128xf32, #tpu.memory_space<vmem>>, vector<8x128xf32>
    tpu.vector_store %arg8[%146, %c0_27], %145 {strides = array<i32>} : memref<8x128xf32, #tpu.memory_space<vmem>>, vector<8x128xf32>,
    %c1_i32 = arith.constant 1 : i32
    %c0_28 = arith.constant 0 : index
    %c0_29 = arith.constant 0 : index
    %148 = vector.load %arg9[%c0_28, %c0_29] : memref<8x128xf32, #tpu.memory_space<vmem>>, vector<8x128xf32>
    tpu.vector_store %arg9[%c0_28, %c0_29], %139 {strides = array<i32>} : memref<8x128xf32, #tpu.memory_space<vmem>>, vector<8x128xf32>,
    return
  }
  func.func @transform_0(%arg0: i32, %arg1: i32) -> (i32, i32) {
    %c0_i32 = arith.constant 0 : i32
    %c0_i32_0 = arith.constant 0 : i32
    return %c0_i32, %arg0 : i32, i32
  }
  func.func @transform_1(%arg0: i32, %arg1: i32) -> (i32, i32) {
    %c0_i32 = arith.constant 0 : i32
    return %arg1, %arg0 : i32, i32
  }
  func.func @transform_2(%arg0: i32, %arg1: i32) -> (i32, i32) {
    %c0_i32 = arith.constant 0 : i32
    %c0_i32_0 = arith.constant 0 : i32
    %c0_i32_1 = arith.constant 0 : i32
    return %c0_i32, %c0_i32_0 : i32, i32
  }
  func.func @transform_3(%arg0: i32, %arg1: i32) -> (i32, i32) {
    %c0_i32 = arith.constant 0 : i32
    %c0_i32_0 = arith.constant 0 : i32
    %c0_i32_1 = arith.constant 0 : i32
    return %c0_i32, %c0_i32_0 : i32, i32
  }
  func.func @transform_4(%arg0: i32, %arg1: i32) -> (i32, i32) {
    %c0_i32 = arith.constant 0 : i32
    %c0_i32_0 = arith.constant 0 : i32
    %c0_i32_1 = arith.constant 0 : i32
    return %c0_i32, %c0_i32_0 : i32, i32
  }
  func.func @transform_5(%arg0: i32, %arg1: i32) -> (i32, i32) {
    %c0_i32 = arith.constant 0 : i32
    return %arg1, %arg0 : i32, i32
  }
  func.func @transform_6(%arg0: i32, %arg1: i32) -> (i32, i32) {
    %c0_i32 = arith.constant 0 : i32
    return %arg1, %arg0 : i32, i32
  }
}

</mosaic_0001>

<bundles_post_ra>
// kernel: tpu_custom_call.1
= control target key start
LH: loop header
LB: loop body
LE: loop exit
PB: predicated region body
PF: predicated region fallthrough
CT: control target
= control target key end

     0   :  { %12 = vsyncpa [#allocation4], 0  ;;  %s943_s0 = inlined_call_operand.vmem [shape: f32[8,128], index: 0, kind: input, shape index: {}]   ;;  %s944_s1 = inlined_call_operand.vmem [shape: f32[8,128], index: 1, kind: input, shape index: {}]   ;;  %s945_s2 = inlined_call_operand.vmem [shape: f32[16,8], index: 2, kind: input, shape index: {}]   ;;  %s946_s3 = inlined_call_operand.vmem [shape: f32[8,16], index: 3, kind: input, shape index: {}]   ;;  %s947_s4 = inlined_call_operand.hbm [shape: f32[8,128], index: 4, kind: input, shape index: {}]   ;;  %s948_s5 = inlined_call_operand.hbm [shape: f32[8,128], index: 5, kind: output, shape index: {0}]   ;;  %s949_s6 = inlined_call_operand.hbm [shape: f32[8,128], index: 6, kind: output, shape index: {1}]  }
   0x1   :  { %13 = vsyncpa [#allocation5], 0 }
   0x2   :  { %14 = vsyncpa [#allocation8], 0  ;;  %s28_s23 = sshll.u32 %s947_s4, 4  ;;  %s715_s24 = smov [#allocation3]   ;;  %s29_s23 = int_to_ptr.hbm [resolvable:$true] %s28_s23 }
   0x3   :  { %s30_s25 = sshll.u32 %s715_s24, 4  ;;  %s31_s25 = int_to_ptr.vmem [resolvable:$true] %s30_s25 }
   0x4   :  { %33 = dma.hbm_to_vmem [thread:$0]  %s29_s23, 128, %s31_s25, [#allocation4]  }
   0x5   :  { %709 = dma.done.wait [#allocation4], 128  }
   0x6   :  { %710 = vsyncadd [#allocation4], 4294967168  ;;  %vm59_vm0 = vcmask 64512   ;;  %v42_v0 = vld [vmem:[%s943_s0] sm:$0xff]  ;;  %v763_v1 = vld [vmem:[%s945_s2 + $0x8] sm:$0xff]  ;;  %vm91_vm1 = vcmask 130048   ;;  %v48_v8 = vlaneseq }
   0x7   :  { %v768_v2 = vld [vmem:[%s945_s2] sm:$0xff]  ;;  %600 = vmatpush.msra.mxu3 %v42_v0  ;;  %81 = vmatpush.msra.mxu0 %v42_v0  ;;  %v716_v16 = vmov 0.0   ;;  %vm503_vm6 = vcmask 1040384   ;;  %vm505_vm7 = vcmask 1041408   ;;  %vm507_vm8 = vcmask 1042432   ;;  %s549_s11 = sshll.u32 %s948_s5, 4  ;;  %s550_s11 = int_to_ptr.hbm [resolvable:$true] %s549_s11 }
   0x8   :  { %577 = vmatmul.msk.f32.vlgmr.msra.gmra.mxu3 %vm59_vm0, %v763_v1  ;;  %576 = vmatmul.msk.f32.vlgmr.msra.gmra.mxu0 %vm59_vm0, %v768_v2  ;;  %v777_v7 = vld [vmem:[%s946_s3] sm:$0xff]  ;;  %v781_v9 = vshrl.u32 %v48_v8, 7  ;;  %vm509_vm9 = vcmask 1043456   ;;  %vm511_vm10 = vcmask 1044480   ;;  %vm513_vm11 = vcmask 1045504   ;;  %s718_s12 = smov [#allocation7]  }
   0x9   :  { %v786_v10 = vld [vmem:[%s944_s1] sm:$0xff]  ;;  %s717_s1 = smov [#allocation6]   ;;  %vm515_vm12 = vcmask 1046528   ;;  %s558_s13 = sshll.u32 %s718_s12, 4  ;;  %s559_s13 = int_to_ptr.vmem [resolvable:$true] %s558_s13 }
   0xa   :  { %v58_v11 = vsub.f32 %v786_v10, %v42_v0  ;;  %vm51_vm2 = vcmp.eq.s32.totalorder %v781_v9, 3  ;;  %vm52_vm3 = vcmp.eq.s32.totalorder %v781_v9, 4  ;;  %v791_v12 = vld [vmem:[#allocation3] sm:$0xff]  ;;  %v119_v20 = vperm.slane %v786_v10, 0  ;;  %s547_s3 = sshll.u32 %s717_s1, 4  ;;  %s560_s16 = sshll.u32 %s949_s6, 4  ;;  %s548_s3 = int_to_ptr.vmem [resolvable:$true] %s547_s3  ;;  %s561_s16 = int_to_ptr.hbm [resolvable:$true] %s560_s16 }
   0xb   :  { %vm53_vm4 = vmor %vm51_vm2, %vm52_vm3  ;;  %vm50_vm5 = vcmp.eq.s32.totalorder %v781_v9, 0  ;;  %v122_v27 = vrot.slane %v786_v10, 7  ;;  %v174_v34 = vperm.slane %v786_v10, 1  ;;  %v225_v46 = vperm.slane %v786_v10, 2 }
   0xc   :  { %v115_v13 = vperm.slane %v58_v11, 0  ;;  %v794_v17 = vsel %vm53_vm4, 1.0, %v716_v16  ;;  %v276_v58 = vperm.slane %v786_v10, 3  ;;  %v327_v11 = vperm.slane %v786_v10, 4 }
   0xd   :  { %v812_v28 = vsub.f32 %v786_v10, %v122_v27 }
   0xf   :  { %v170_v29 = vperm.slane %v812_v28, 1  ;;  %v221_v41 = vperm.slane %v812_v28, 2  ;;  %v272_v53 = vperm.slane %v812_v28, 3 }
  0x85   :  { %v83_v3 = vpop.f32.mrf.mxu0 }
  0x86   :  { %605 = vtanh.f32 %v83_v3  ;;  %v323_v3 = vperm.slane %v812_v28, 4 }
  0x8b   :  { %v86_v4 = vpop.f32.mrf.mxu3 }
  0x8c   :  { %607 = vtanh.f32 %v86_v4  ;;  %v606_v5 = vpop.eup %605 }
  0x92   :  { %v608_v6 = vpop.eup %607 }
  0x93   :  { %109 = vmatpush.msra.mxu1 %v608_v6 }
  0x95   :  { %110 = vmatpush.msra.mxu1 %v606_v5 }
  0x96   :  { %578 = vmatmul.msk.f32.vlgmr.msra.gmra.mxu1 %vm91_vm1, %v777_v7 }
 0x113   :  { %v112_v14 = vpop.f32.mrf.mxu1 }
 0x114   :  { %v113_v15 = vadd.f32 %v112_v14, %v791_v12 }
 0x116   :  { %v116_v18 = vmul.f32 %v115_v13, %v113_v15 }
 0x118   :  { %v117_v19 = vmul.f32 %v794_v17, %v116_v18 }
 0x11a   :  { %v118_v21 = vadd.f32 %v117_v19, %v42_v0 }
 0x11c   :  { %v801_v22 = vsel %vm50_vm5, %v119_v20, %v118_v21  ;;  %v374_v20 = vperm.slane %v812_v28, 5 }
 0x11d   :  { %140 = vmatpush.msra.mxu2 %v801_v22 }
 0x11e   :  { %579 = vmatmul.msk.f32.vlgmr.msra.gmra.mxu2 %vm59_vm0, %v768_v2 }
 0x126   :  { %580 = vmatmul.msk.f32.gmra.mxu2 %vm59_vm0, %v763_v1 }
 0x1a1   :  { %v142_v23 = vpop.f32.mrf.mxu2 }
 0x1a9   :  { %v145_v24 = vpop.f32.mrf.mxu2 }
 0x1aa   :  { %609 = vtanh.f32 %v145_v24 }
 0x1ab   :  { %611 = vtanh.f32 %v142_v23 }
 0x1b0   :  { %v610_v25 = vpop.eup %609 }
 0x1b1   :  { %164 = vmatpush.msrb.mxu3 %v610_v25  ;;  %v612_v26 = vpop.eup %611 }
 0x1b3   :  { %165 = vmatpush.msrb.mxu3 %v612_v26  ;;  %v378_v26 = vperm.slane %v786_v10, 5 }
 0x1b4   :  { %581 = vmatmul.msk.f32.vlgmr.msrb.gmra.mxu3 %vm91_vm1, %v777_v7 }
 0x237   :  { %v167_v30 = vpop.f32.mrf.mxu3 }
 0x238   :  { %v168_v31 = vadd.f32 %v167_v30, %v791_v12 }
 0x23a   :  { %v171_v32 = vmul.f32 %v170_v29, %v168_v31 }
 0x23c   :  { %v172_v33 = vmul.f32 %v794_v17, %v171_v32 }
 0x23e   :  { %v173_v35 = vadd.f32 %v172_v33, %v801_v22 }
 0x240   :  { %v821_v36 = vsel %vm50_vm5, %v174_v34, %v173_v35  ;;  %v425_v34 = vperm.slane %v812_v28, 6 }
 0x241   :  { %191 = vmatpush.msrb.mxu1 %v821_v36 }
 0x242   :  { %582 = vmatmul.msk.f32.vlgmr.msrb.gmra.mxu1 %vm59_vm0, %v768_v2 }
 0x24a   :  { %583 = vmatmul.msk.f32.gmra.mxu1 %vm59_vm0, %v763_v1 }
 0x2bf   :  { %v193_v37 = vpop.f32.mrf.mxu1 }
 0x2c7   :  { %v196_v38 = vpop.f32.mrf.mxu1 }
 0x2c8   :  { %613 = vtanh.f32 %v196_v38 }
 0x2c9   :  { %615 = vtanh.f32 %v193_v37 }
 0x2ce   :  { %v614_v39 = vpop.eup %613 }
 0x2cf   :  { %215 = vmatpush.msra.mxu3 %v614_v39  ;;  %v616_v40 = vpop.eup %615 }
 0x2d1   :  { %216 = vmatpush.msra.mxu3 %v616_v40  ;;  %v429_v40 = vperm.slane %v786_v10, 6 }
 0x2d2   :  { %584 = vmatmul.msk.f32.vlgmr.msra.gmra.mxu3 %vm91_vm1, %v777_v7 }
 0x355   :  { %v218_v42 = vpop.f32.mrf.mxu3 }
 0x356   :  { %v219_v43 = vadd.f32 %v218_v42, %v791_v12 }
 0x358   :  { %v222_v44 = vmul.f32 %v221_v41, %v219_v43 }
 0x35a   :  { %v223_v45 = vmul.f32 %v794_v17, %v222_v44 }
 0x35c   :  { %v224_v47 = vadd.f32 %v223_v45, %v821_v36 }
 0x35e   :  { %v837_v48 = vsel %vm50_vm5, %v225_v46, %v224_v47  ;;  %v486_v47 = vrot.slane %v821_v36, 2 }
 0x35f   :  { %242 = vmatpush.msrb.mxu0 %v837_v48 }
 0x360   :  { %585 = vmatmul.msk.f32.vlgmr.msrb.gmra.mxu0 %vm59_vm0, %v768_v2 }
 0x368   :  { %586 = vmatmul.msk.f32.gmra.mxu0 %vm59_vm0, %v763_v1 }
 0x3dd   :  { %v244_v49 = vpop.f32.mrf.mxu0 }
 0x3e5   :  { %v247_v50 = vpop.f32.mrf.mxu0 }
 0x3e6   :  { %617 = vtanh.f32 %v247_v50 }
 0x3e7   :  { %619 = vtanh.f32 %v244_v49  ;;  %v476_v49 = vperm.slane %v812_v28, 7 }
 0x3ec   :  { %v618_v51 = vpop.eup %617 }
 0x3ed   :  { %266 = vmatpush.msrb.mxu2 %v618_v51  ;;  %v620_v52 = vpop.eup %619  ;;  %v483_v51 = vrot.slane %v801_v22, 3 }
 0x3ef   :  { %267 = vmatpush.msrb.mxu2 %v620_v52 }
 0x3f0   :  { %587 = vmatmul.msk.f32.vlgmr.msrb.gmra.mxu2 %vm91_vm1, %v777_v7 }
 0x473   :  { %v269_v54 = vpop.f32.mrf.mxu2 }
 0x474   :  { %v270_v55 = vadd.f32 %v269_v54, %v791_v12  ;;  %v522_v54 = vrot.slane %v837_v48, 2 }
 0x476   :  { %v273_v56 = vmul.f32 %v272_v53, %v270_v55  ;;  %v518_v53 = vrot.slane %v801_v22, 4 }
 0x478   :  { %v274_v57 = vmul.f32 %v794_v17, %v273_v56 }
 0x47a   :  { %v275_v59 = vadd.f32 %v274_v57, %v837_v48 }
 0x47c   :  { %v853_v60 = vsel %vm50_vm5, %v276_v58, %v275_v59  ;;  %v480_v59 = vperm.slane %v786_v10, 7 }
 0x47d   :  { %293 = vmatpush.msrb.mxu3 %v853_v60  ;;  %v525_v28 = vrot.slane %v853_v60, 1 }
 0x47e   :  { %588 = vmatmul.msk.f32.vlgmr.msrb.gmra.mxu3 %vm59_vm0, %v768_v2 }
 0x486   :  { %589 = vmatmul.msk.f32.gmra.mxu3 %vm59_vm0, %v763_v1 }
 0x501   :  { %v295_v61 = vpop.f32.mrf.mxu3 }
 0x509   :  { %v298_v62 = vpop.f32.mrf.mxu3 }
 0x50a   :  { %621 = vtanh.f32 %v298_v62 }
 0x50b   :  { %623 = vtanh.f32 %v295_v61 }
 0x510   :  { %v622_v63 = vpop.eup %621 }
 0x511   :  { %317 = vmatpush.msra.mxu2 %v622_v63  ;;  %v624_v0 = vpop.eup %623 }
 0x513   :  { %318 = vmatpush.msra.mxu2 %v624_v0 }
 0x514   :  { %590 = vmatmul.msk.f32.vlgmr.msra.gmra.mxu2 %vm91_vm1, %v777_v7 }
 0x597   :  { %v320_v4 = vpop.f32.mrf.mxu2 }
 0x598   :  { %v321_v5 = vadd.f32 %v320_v4, %v791_v12 }
 0x59a   :  { %v324_v6 = vmul.f32 %v323_v3, %v321_v5 }
 0x59c   :  { %v325_v8 = vmul.f32 %v794_v17, %v324_v6 }
 0x59e   :  { %v326_v13 = vadd.f32 %v325_v8, %v853_v60 }
 0x5a0   :  { %v869_v14 = vsel %vm50_vm5, %v327_v11, %v326_v13 }
 0x5a1   :  { %344 = vmatpush.msra.mxu1 %v869_v14 }
 0x5a2   :  { %591 = vmatmul.msk.f32.vlgmr.msra.gmra.mxu1 %vm59_vm0, %v768_v2 }
 0x5aa   :  { %592 = vmatmul.msk.f32.gmra.mxu1 %vm59_vm0, %v763_v1 }
 0x61f   :  { %v346_v15 = vpop.f32.mrf.mxu1 }
 0x627   :  { %v349_v16 = vpop.f32.mrf.mxu1 }
 0x628   :  { %625 = vtanh.f32 %v349_v16 }
 0x629   :  { %627 = vtanh.f32 %v346_v15 }
 0x62e   :  { %v626_v18 = vpop.eup %625 }
 0x62f   :  { %368 = vmatpush.msra.mxu0 %v626_v18  ;;  %v628_v19 = vpop.eup %627 }
 0x631   :  { %369 = vmatpush.msra.mxu0 %v628_v19 }
 0x632   :  { %593 = vmatmul.msk.f32.vlgmr.msra.gmra.mxu0 %vm91_vm1, %v777_v7 }
 0x6af   :  { %v371_v21 = vpop.f32.mrf.mxu0 }
 0x6b0   :  { %v372_v23 = vadd.f32 %v371_v21, %v791_v12 }
 0x6b2   :  { %v375_v24 = vmul.f32 %v374_v20, %v372_v23 }
 0x6b4   :  { %v376_v25 = vmul.f32 %v794_v17, %v375_v24 }
 0x6b6   :  { %v377_v27 = vadd.f32 %v376_v25, %v869_v14 }
 0x6b8   :  { %v885_v29 = vsel %vm50_vm5, %v378_v26, %v377_v27 }
 0x6b9   :  { %395 = vmatpush.msrb.mxu2 %v885_v29  ;;  %v527_v22 = vrot.slane %v885_v29, 7 }
 0x6ba   :  { %594 = vmatmul.msk.f32.vlgmr.msrb.gmra.mxu2 %vm59_vm0, %v768_v2 }
 0x6c2   :  { %595 = vmatmul.msk.f32.gmra.mxu2 %vm59_vm0, %v763_v1 }
 0x73d   :  { %v397_v30 = vpop.f32.mrf.mxu2 }
 0x745   :  { %v400_v31 = vpop.f32.mrf.mxu2 }
 0x746   :  { %629 = vtanh.f32 %v400_v31 }
 0x747   :  { %631 = vtanh.f32 %v397_v30 }
 0x74c   :  { %v630_v32 = vpop.eup %629 }
 0x74d   :  { %419 = vmatpush.msra.mxu3 %v630_v32  ;;  %v632_v33 = vpop.eup %631 }
 0x74f   :  { %420 = vmatpush.msra.mxu3 %v632_v33 }
 0x750   :  { %596 = vmatmul.msk.f32.vlgmr.msra.gmra.mxu3 %vm91_vm1, %v777_v7 }
 0x7d3   :  { %v422_v35 = vpop.f32.mrf.mxu3 }
 0x7d4   :  { %v423_v37 = vadd.f32 %v422_v35, %v791_v12 }
 0x7d6   :  { %v426_v38 = vmul.f32 %v425_v34, %v423_v37 }
 0x7d8   :  { %v427_v39 = vmul.f32 %v794_v17, %v426_v38 }
 0x7da   :  { %v428_v41 = vadd.f32 %v427_v39, %v885_v29 }
 0x7dc   :  { %v901_v42 = vsel %vm50_vm5, %v429_v40, %v428_v41 }
 0x7dd   :  { %446 = vmatpush.msrb.mxu0 %v901_v42  ;;  %v529_v62 = vrot.slane %v901_v42, 6 }
 0x7de   :  { %597 = vmatmul.msk.f32.vlgmr.msrb.gmra.mxu0 %vm59_vm0, %v768_v2  ;;  %v520_v2 = vrot.slane %v821_v36, 3  ;;  %v492_v36 = vrot.slane %v869_v14, 7 }
 0x7e0   :  { %v533_v56 = vsel %vm503_vm6, %v518_v53, %v520_v2 }
 0x7e1   :  { %v534_v61 = vsel %vm505_vm7, %v533_v56, %v522_v54 }
 0x7e2   :  { %v535_v3 = vsel %vm507_vm8, %v534_v61, %v525_v28 }
 0x7e3   :  { %v536_v10 = vsel %vm509_vm9, %v535_v3, %v869_v14 }
 0x7e4   :  { %v537_v8 = vsel %vm511_vm10, %v536_v10, %v527_v22 }
 0x7e5   :  { %v538_v9 = vsel %vm513_vm11, %v537_v8, %v529_v62 }
 0x7e6   :  { %598 = vmatmul.msk.f32.gmra.mxu0 %vm59_vm0, %v763_v1  ;;  %v489_v1 = vrot.slane %v837_v48, 1  ;;  %v498_v48 = vrot.slane %v901_v42, 5 }
 0x85b   :  { %v448_v43 = vpop.f32.mrf.mxu0 }
 0x863   :  { %v451_v44 = vpop.f32.mrf.mxu0 }
 0x864   :  { %633 = vtanh.f32 %v451_v44 }
 0x865   :  { %635 = vtanh.f32 %v448_v43 }
 0x86a   :  { %v634_v45 = vpop.eup %633 }
 0x86b   :  { %470 = vmatpush.msrb.mxu1 %v634_v45  ;;  %v636_v46 = vpop.eup %635 }
 0x86d   :  { %471 = vmatpush.msrb.mxu1 %v636_v46 }
 0x86e   :  { %599 = vmatmul.msk.f32.vlgmr.msrb.gmra.mxu1 %vm91_vm1, %v777_v7  ;;  %v504_v7 = vsel %vm503_vm6, %v483_v51, %v486_v47 }
 0x86f   :  { %v506_v57 = vsel %vm505_vm7, %v504_v7, %v489_v1 }
 0x870   :  { %v508_v0 = vsel %vm507_vm8, %v506_v57, %v853_v60 }
 0x871   :  { %v510_v4 = vsel %vm509_vm9, %v508_v0, %v492_v36 }
 0x8eb   :  { %v473_v50 = vpop.f32.mrf.mxu1 }
 0x8ec   :  { %v474_v52 = vadd.f32 %v473_v50, %v791_v12  ;;  %v495_v12 = vrot.slane %v885_v29, 6 }
 0x8ee   :  { %v477_v55 = vmul.f32 %v476_v49, %v474_v52  ;;  %v512_v5 = vsel %vm511_vm10, %v510_v4, %v495_v12 }
 0x8ef   :  { %v514_v11 = vsel %vm513_vm11, %v512_v5, %v498_v48 }
 0x8f0   :  { %v478_v58 = vmul.f32 %v794_v17, %v477_v55 }
 0x8f2   :  { %v479_v63 = vadd.f32 %v478_v58, %v901_v42 }
 0x8f4   :  { %v481_v17 = vsel %vm50_vm5, %v480_v59, %v479_v63 }
 0x8f5   :  { %v501_v60 = vrot.slane %v481_v17, 4  ;;  %v531_v6 = vrot.slane %v481_v17, 5 }
 0x8f7   :  { %v516_v13 = vsel %vm515_vm12, %v514_v11, %v501_v60  ;;  %v539_v14 = vsel %vm515_vm12, %v538_v9, %v531_v6 }
 0x8f8   :  { %517 = vst [vmem:[#allocation6] sm:$0xff] %v516_v13 }
 0x8f9   :  { %552 = dma.vmem_to_hbm [thread:$0]  %s548_s3, 128, %s550_s11, [#allocation5]   ;;  %540 = vst [vmem:[#allocation7] sm:$0xff] %v539_v14 }
 0x8fa   :  { %563 = dma.vmem_to_hbm [thread:$0]  %s559_s13, 128, %s561_s16, [#allocation8]  }
 0x8fb   :  { %711 = dma.done.wait [#allocation5], 128  }
 0x8fc   :  { %712 = vsyncadd [#allocation5], 4294967168 }
 0x8fd   :  { %713 = dma.done.wait [#allocation8], 128  }
 0x8fe   :  { %714 = vsyncadd [#allocation8], 4294967168 }
 0x8ff   :  { %572 = vsyncpa [#allocation4], 1 }
 0x900   :  { %573 = vsyncpa [#allocation5], 1 }
 0x901   :  { %574 = vsyncpa [#allocation8], 1 }

</bundles_post_ra>
